<compile_context>
chip_gen: v5e
topology: v5e:2x2
jax: 0.10.0
libtpu: 0.0.40
codegen_flags: <defaults>
</compile_context>

<pallas_src>
import numpy as np
import jax
import jax.numpy as jnp
from jax import lax
from jax.experimental import pallas as pl
from jax.experimental.pallas import tpu as pltpu

# ---- fixed (non-trainable) module constants, from __init__ defaults ----
BASE = 2.0
H_MIN = 15.0 / 60.0 / 24.0
H_MAX = 9.0 * 30.0
P_MIN = 1e-4
P_MAX = 0.9999
EPS = 1e-6
LOG2_BASE = float(np.log2(BASE))

LANES = 128


def _cdiv(a, b):
    return -(-a // b)


def _round_up(a, m):
    return _cdiv(a, m) * m


def hlr_kernel(x_ref, w_ref, et_ref, out_ref):
    # fx^T = w @ x^T  ->  (1, tb): single MXU call per tile, batch lane-dense.
    fx = lax.dot_general(
        w_ref[...], x_ref[...],
        dimension_numbers=(((1,), (1,)), ((), ())),   # contract both F dims
        preferred_element_type=jnp.float32,
    )                                                  # (1, tb)

    # ex = fx + emb[l] + bias   (bias folded into row 0 of et by the wrapper)
    ex = fx + et_ref[0:1, :]                           # (1, tb) lane-dense

    # half_life = clamp(base ** ex, h_min, h_max)
    hl = jnp.clip(jnp.exp2(ex * LOG2_BASE), H_MIN, H_MAX)

    # prob = clamp(2 ** (-t / (half_life + eps)), p_min, p_max)
    prob = jnp.clip(jnp.exp2(-et_ref[1:2, :] / (hl + EPS)), P_MIN, P_MAX)

    # One combined lane-dense output slab: row 0 = prob, row 1 = half_life.
    out_ref[0:1, :] = prob
    out_ref[1:2, :] = hl


def validate_params(w, emb):
    """Torch module's finiteness assert; run once, outside the hot path."""
    ok = bool(jnp.all(jnp.isfinite(w))) and bool(jnp.all(jnp.isfinite(emb)))
    assert ok, "NaN value in prob or half_life!"


def _choose_tb(B, F, tb=None):
    """Pick the batch tile: large (amortize per-step cost), VMEM-safe,
    multiple of 128, and giving >=2 grid steps when B allows (v7x megacore)."""
    if tb is None:
        Fp = _round_up(F, LANES)                       # lane-padded width in VMEM
        tb_bw = max(LANES, (1 << 20) // (F * 4))       # ~1 MiB raw x per grid step
        tb_vmem = max(LANES, (8 << 20) // (Fp * 4))    # <=8 MiB lane-padded / buffer
        tb = min(tb_bw, tb_vmem)
    tb = min(int(tb), _round_up(B, LANES))             # no point exceeding the batch
    tb = max(LANES, (tb // LANES) * LANES)
    if B > 2 * LANES and _cdiv(B, tb) < 2:
        # Split into (at least) two tiles so both v7x TensorCores get work.
        tb = max(LANES, _round_up(_cdiv(B, 2), LANES))
    return tb


def half_life_regression(x, l, t, w, b, emb, *, tb=None):
    """x: (B, F) float, l: (B,) int, t: (B,) float, w: (1, F), b: (1,), emb: (L, 1).

    Returns (prob, half_life), each (B, 1) float32.
    """
    B, F = x.shape
    tb = _choose_tb(B, F, tb)
    n_tiles = _cdiv(B, tb)                             # ragged last block allowed

    x = x.astype(jnp.float32)                          # no-op if already f32
    w_row = jnp.reshape(w, (1, F)).astype(jnp.float32)
    bias = jnp.reshape(b, ()).astype(jnp.float32)

    # Embedding gather + bias fold done by XLA on the tiny (L, 1) table; this
    # removes all lexeme-vocabulary-dependent work from the kernel.  Pack the
    # two per-example scalars into ONE (2, B) lane-major stream (row 0 =
    # emb[l] + bias, row 1 = t) -> a single DMA per grid step.
    e = emb.reshape(-1).astype(jnp.float32)[l.astype(jnp.int32)]   # (B,)
    et = jnp.stack([e + bias, t.astype(jnp.float32)], axis=0)      # (2, B)

    cost = pl.CostEstimate(
        flops=2 * B * F + 8 * B,
        transcendentals=2 * B,
        bytes_accessed=(B * F + 2 * B + F + 2 * B) * 4,
    )

    out = pl.pallas_call(
        hlr_kernel,
        out_shape=jax.ShapeDtypeStruct((2, B), jnp.float32),
        grid_spec=pltpu.PrefetchScalarGridSpec(
            num_scalar_prefetch=0,
            grid=(n_tiles,),
            in_specs=[
                pl.BlockSpec((tb, F), lambda i: (i, 0)),   # x tile (HBM-bound stream)
                pl.BlockSpec((1, F), lambda i: (0, 0)),    # w row (replicated)
                pl.BlockSpec((2, tb), lambda i: (0, i)),   # [emb[l]+bias ; t] lane-dense
            ],
            out_specs=pl.BlockSpec((2, tb), lambda i: (0, i)),   # [prob; half_life]
        ),
        compiler_params=pltpu.CompilerParams(
            dimension_semantics=("parallel",),          # shard grid across TCs (v7x)
            vmem_limit_bytes=32 * 1024 * 1024,
        ),
        cost_estimate=cost,
    )(x, w_row, et)

    prob = out[0, :].reshape(B, 1)
    hl = out[1, :].reshape(B, 1)
    return prob, hl


def reference(x, l, t, w, b, emb):
    fx = x @ jnp.reshape(w, (1, -1)).T + jnp.reshape(b, ())   # (B, 1)
    e = emb.reshape(-1)[l].reshape(-1, 1)                     # (B, 1)
    ex = fx + e
    hl = jnp.clip(jnp.exp2(ex * LOG2_BASE), H_MIN, H_MAX)
    prob = jnp.clip(jnp.exp2(-t.reshape(-1, 1) / (hl + EPS)), P_MIN, P_MAX)
    return prob, hl


if __name__ == "__main__":
    # Non-multiple-of-128 batch exercises the ragged-last-block path; the
    # auto tile-picker gives tb=512 -> a 2-step grid (pipelining + megacore
    # sharding path exercised) with no padding copy of x.
    B, F, L = 1000, 32, 64

    key = jax.random.PRNGKey(0)
    kx, kl, kt, kw, kb, ke = jax.random.split(key, 6)

    x = jax.random.normal(kx, (B, F), dtype=jnp.float32)
    l = jax.random.randint(kl, (B,), 0, L, dtype=jnp.int32)
    t = jax.random.uniform(kt, (B,), minval=0.1, maxval=30.0, dtype=jnp.float32)

    # Deterministic parameter init (module default is zeros, which makes the
    # output constant; use small deterministic values so compute is exercised).
    w = 0.05 * jax.random.normal(kw, (1, F), dtype=jnp.float32)   # torch Linear.weight layout
    b = 0.1 * jax.random.normal(kb, (1,), dtype=jnp.float32)
    emb = 0.05 * jax.random.normal(ke, (L, 1), dtype=jnp.float32)

    validate_params(w, emb)   # once, outside the per-call hot path

    prob, hl = half_life_regression(x, l, t, w, b, emb)
    jax.block_until_ready((prob, hl))

    prob_ref, hl_ref = reference(x, l, t, w, b, emb)
    np.testing.assert_allclose(np.asarray(hl), np.asarray(hl_ref), rtol=1e-4, atol=1e-6)
    np.testing.assert_allclose(np.asarray(prob), np.asarray(prob_ref), rtol=1e-4, atol=1e-6)

    print("KERNEL_OK")
</pallas_src>

<mosaic_0001>
module attributes {stable_mosaic.version = 11 : i64} {
  func.func @hlr_kernel(%arg0: i32, %arg1: memref<512x32xf32, #tpu.memory_space<vmem>>, %arg2: memref<1x32xf32, #tpu.memory_space<vmem>>, %arg3: memref<2x512xf32, #tpu.memory_space<vmem>>, %arg4: memref<2x512xf32, #tpu.memory_space<vmem>>) attributes {dimension_semantics = [#tpu.dimension_semantics<parallel>], iteration_bounds = array<i64: 2>, scalar_prefetch = 0 : i64, scratch_operands = 0 : i64, tpu.core_type = #tpu.core_type<tc>, window_params = [{transform_indices = @transform_0, window_bounds = array<i64: 512, 32>}, {pipeline_mode = #tpu.pipeline_mode<synchronous>, transform_indices = @transform_1, window_bounds = array<i64: 1, 32>}, {transform_indices = @transform_2, window_bounds = array<i64: 2, 512>}, {transform_indices = @transform_3, window_bounds = array<i64: 2, 512>}]} {
    %c0 = arith.constant 0 : index
    %c0_0 = arith.constant 0 : index
    %0 = vector.load %arg2[%c0, %c0_0] : memref<1x32xf32, #tpu.memory_space<vmem>>, vector<1x32xf32>
    %c0_1 = arith.constant 0 : index
    %c0_2 = arith.constant 0 : index
    %1 = vector.load %arg1[%c0_1, %c0_2] : memref<512x32xf32, #tpu.memory_space<vmem>>, vector<512x32xf32>
    %cst = arith.constant dense<0.000000e+00> : vector<1x512xf32>
    %2 = tpu.matmul %0, %1, %cst {dimension_numbers = #tpu.dot_dimension_numbers<[1], [1], [0], [0], [0, 0, 1, 0], [], []>} : vector<1x32xf32>, vector<512x32xf32>, vector<1x512xf32> -> vector<1x512xf32>
    %c0_3 = arith.constant 0 : index
    %c0_4 = arith.constant 0 : index
    %3 = vector.load %arg3[%c0_3, %c0_4] : memref<2x512xf32, #tpu.memory_space<vmem>>, vector<1x512xf32>
    %4 = arith.addf %2, %3 : vector<1x512xf32>
    %cst_5 = arith.constant 1.000000e+00 : f32
    %5 = vector.broadcast %cst_5 : f32 to vector<1x512xf32>
    %6 = arith.mulf %4, %5 : vector<1x512xf32>
    %7 = math.exp2 %6 : vector<1x512xf32>
    %cst_6 = arith.constant 0.010416667 : f32
    %cst_7 = arith.constant 2.700000e+02 : f32
    %8 = vector.broadcast %cst_6 : f32 to vector<1x512xf32>
    %9 = arith.maximumf %8, %7 : vector<1x512xf32>
    %10 = vector.broadcast %cst_7 : f32 to vector<1x512xf32>
    %11 = arith.minimumf %10, %9 : vector<1x512xf32>
    %c1 = arith.constant 1 : index
    %c0_8 = arith.constant 0 : index
    %12 = vector.load %arg3[%c1, %c0_8] : memref<2x512xf32, #tpu.memory_space<vmem>>, vector<1x512xf32>
    %cst_9 = arith.constant 0.000000e+00 : f32
    %13 = vector.broadcast %cst_9 : f32 to vector<1x512xf32>
    %14 = arith.subf %13, %12 : vector<1x512xf32>
    %cst_10 = arith.constant 9.99999997E-7 : f32
    %15 = vector.broadcast %cst_10 : f32 to vector<1x512xf32>
    %16 = arith.addf %11, %15 : vector<1x512xf32>
    %17 = arith.divf %14, %16 : vector<1x512xf32>
    %18 = math.exp2 %17 : vector<1x512xf32>
    %cst_11 = arith.constant 9.99999974E-5 : f32
    %cst_12 = arith.constant 0.999899983 : f32
    %19 = vector.broadcast %cst_11 : f32 to vector<1x512xf32>
    %20 = arith.maximumf %19, %18 : vector<1x512xf32>
    %21 = vector.broadcast %cst_12 : f32 to vector<1x512xf32>
    %22 = arith.minimumf %21, %20 : vector<1x512xf32>
    %c0_13 = arith.constant 0 : index
    %c0_14 = arith.constant 0 : index
    %23 = vector.load %arg4[%c0_13, %c0_14] : memref<2x512xf32, #tpu.memory_space<vmem>>, vector<1x512xf32>
    tpu.vector_store %arg4[%c0_13, %c0_14], %22 {strides = array<i32>} : memref<2x512xf32, #tpu.memory_space<vmem>>, vector<1x512xf32>,
    %c1_15 = arith.constant 1 : index
    %c0_16 = arith.constant 0 : index
    %24 = vector.load %arg4[%c1_15, %c0_16] : memref<2x512xf32, #tpu.memory_space<vmem>>, vector<1x512xf32>
    tpu.vector_store %arg4[%c1_15, %c0_16], %11 {strides = array<i32>} : memref<2x512xf32, #tpu.memory_space<vmem>>, vector<1x512xf32>,
    return
  }
  func.func @transform_0(%arg0: i32) -> (i32, i32) {
    %c0_i32 = arith.constant 0 : i32
    %c0_i32_0 = arith.constant 0 : i32
    return %arg0, %c0_i32 : i32, i32
  }
  func.func @transform_1(%arg0: i32) -> (i32, i32) {
    %c0_i32 = arith.constant 0 : i32
    %c0_i32_0 = arith.constant 0 : i32
    %c0_i32_1 = arith.constant 0 : i32
    return %c0_i32, %c0_i32_0 : i32, i32
  }
  func.func @transform_2(%arg0: i32) -> (i32, i32) {
    %c0_i32 = arith.constant 0 : i32
    %c0_i32_0 = arith.constant 0 : i32
    return %c0_i32, %arg0 : i32, i32
  }
  func.func @transform_3(%arg0: i32) -> (i32, i32) {
    %c0_i32 = arith.constant 0 : i32
    %c0_i32_0 = arith.constant 0 : i32
    return %c0_i32, %arg0 : i32, i32
  }
}

</mosaic_0001>

<bundles_post_ra>
// kernel: tpu_custom_call.1
= control target key start
LH: loop header
LB: loop body
LE: loop exit
PB: predicated region body
PF: predicated region fallthrough
CT: control target
= control target key end

     0   :  { %8 = vsyncpa [#allocation3], 0  ;;  %s1190_s0 = inlined_call_operand.vmem [shape: f32[1000,32], index: 0, kind: input, shape index: {}]   ;;  %s1191_s1 = inlined_call_operand.vmem [shape: f32[1,32], index: 1, kind: input, shape index: {}]   ;;  %s1192_s2 = inlined_call_operand.vmem [shape: f32[2,1000], index: 2, kind: input, shape index: {}]   ;;  %s1193_s3 = inlined_call_operand.hbm [shape: f32[2,1000], index: 3, kind: output, shape index: {}]  }
   0x1   :  { %10 = vsyncpa [#allocation3 + $0x1], 0  ;;  %s942_s12 = smov 0   ;;  %s944_s13 = smov 0  }
   0x2   :  { %s946_s14 = smov 0   ;;  %s948_s15 = smov 0  }
   0x3 LB: > { %s963_s16 = sadd.s32 4294967295, %s920_s15   ;;  %s722_s17 = sadd.s32 4294967294, %s920_s15   ;;  %s920_s15 = sphi %s948_s15, %s1201_s15   ;;  %s916_s14 = sphi %s946_s14, %s1200_s14   ;;  %s912_s13 = sphi %s944_s13, %s1199_s13   ;;  %s908_s12 = sphi %s942_s12, %s1198_s12  }
   0x4   : > { %s967_s18 = sadd.s32 1, %s920_s15   ;;  %s96_s19 = sadd.s32 1, %s916_s14 }
   0x5   : > { %s93_s20 = ssub.s32 %s920_s15, %s967_s18  ;;  %p106_p0 = scmp.ne.s32.totalorder %s916_s14, %s912_s13 }
   0x6   : > { %p94_p1 = scmp.eq.s32.totalorder %s93_s20, 0  ;;  %p107_p2 = scmp.eq.s32.totalorder %s963_s16, 1 }
   0x7   : > { %p112_p3 = scmp.ne.s32.totalorder %s912_s13, %s908_s12  ;;  %p113_p4 = scmp.eq.s32.totalorder %s722_s17, 1 }
   0x8   : > { %s978_s21 = scalar_select %p94_p1, %s916_s14, %s96_s19  }
   0x9   : > { %p980_p5 = por %p107_p2, %p106_p0  ;;  %p984_p6 = por %p113_p4, %p112_p3 }
   0xa   : > { %p725_p7 = scmp.ge.s32.totalorder %s920_s15, 1  ;;  %p160_p8 = scmp.lt.s32.totalorder %s920_s15, 3 }
   0xc   : > { %p161_p9 = pnand %p725_p7, %p160_p8 }
   0xd   : > { %s727_s24 = sshll.u32 (!%p161_p9), %s963_s16, 6  ;;  %s729_s4 = sshll.u32 (!%p161_p9), %s963_s16, 2 }
   0xe   : > { %164 = sbr.rel (%p161_p9) target bundleno = 271 (0x10f), region = 32  ;;  %p198_p10 = scmp.lt.s32.totalorder (!%p161_p9), %s727_s24, 124 }
   0xf   : > { %p208_p11 = scmp.lt.s32.totalorder (!%p161_p9), %s729_s4, 7  ;;  %s190_s9 = sand.u32 (!%p161_p9), 1, %s912_s13  }
  0x10   : > { %s726_s10 = sshll.u32 (!%p161_p9), %s190_s9, 3  ;;  %s806_s17 = sshll.u32 (!%p161_p9), %s963_s16, 3 }
  0x11   : > { %s1147_s11 = scalar_lea.vmem (!%p161_p9), [#allocation2], %s726_s10  ;;  %s635_s27 = scalar_lea.sflag (!%p161_p9), [#allocation3], %s190_s9 }
  0x13   : > { %s1203_s24 = smov (!%p198_p10, %s727_s24), 124  ;;  %vm289_vm0 = vcmask 261120   ;;  %s1205_s4 = smov (!%p208_p11, %s729_s4), 7  ;;  %vm591_vm1 = vcmask 1040384   ;;  %vm593_vm2 = vcmask 1042434   ;;  %vm595_vm3 = vcmask 1041408  }
  0x14   : > { %s728_s25 = sshll.u32 %s1203_s24, 3  ;;  %s730_s5 = sshll.u32 %s1205_s4, 1 }
  0x15   : > { %s994_s28 = scalar_lea.vmem %s1190_s0, %s728_s25  ;;  %s1135_s8 = scalar_lea.vmem %s1192_s2, %s730_s5 }
  0x16   : > { %v262_v0 = vld [vmem:[%s994_s28 + $0x178] sm:$0xff]  ;;  %v261_v4 = vld [vmem:[%s994_s28 + $0x170] sm:$0xff]  ;;  %v260_v8 = vld [vmem:[%s994_s28 + $0x168] sm:$0xff]  ;;  %s646_s24 = scalar_lea.hbm %s1193_s3, %s806_s17  ;;  %s648_s25 = sshll.u32 %s1147_s11, 4  ;;  %s649_s25 = int_to_ptr.vmem [resolvable:$true] %s648_s25 }
  0x17   : > { %v278_v1 = vld [vmem:[%s994_s28 + $0x1f8] sm:$0xff]  ;;  %765 = vmatpush.xpose.msk.msra.mxu2 %vm289_vm0, %v262_v0  ;;  %v277_v5 = vld [vmem:[%s994_s28 + $0x1f0] sm:$0xff]  ;;  %v276_v9 = vld [vmem:[%s994_s28 + $0x1e8] sm:$0xff]  ;;  %s650_s26 = sshll.u32 %s646_s24, 4  ;;  %s878_s4 = scalar_lea.hbm %s1193_s3, 16  ;;  %s651_s26 = int_to_ptr.hbm [resolvable:$true] %s650_s26 }
  0x18   : > { %782 = vmatpush.xpose.msk.msra.mxu3 %vm289_vm0, %v278_v1  ;;  %v246_v2 = vld [vmem:[%s994_s28 + $0xf8] sm:$0xff]  ;;  %v245_v6 = vld [vmem:[%s994_s28 + $0xf0] sm:$0xff]  ;;  %v244_v10 = vld [vmem:[%s994_s28 + $0xe8] sm:$0xff] }
  0x19   : > { %v230_v3 = vld [vmem:[%s994_s28 + $0x78] sm:$0xff]  ;;  %748 = vmatpush.xpose.msk.msra.mxu1 %vm289_vm0, %v246_v2  ;;  %v229_v7 = vld [vmem:[%s994_s28 + $0x70] sm:$0xff]  ;;  %v228_v11 = vld [vmem:[%s994_s28 + $0x68] sm:$0xff] }
  0x1a   : > { %731 = vmatpush.xpose.msk.msra.mxu0 %vm289_vm0, %v230_v3  ;;  %v259_v12 = vld [vmem:[%s994_s28 + $0x160] sm:$0xff]  ;;  %v258_v16 = vld [vmem:[%s994_s28 + $0x158] sm:$0xff]  ;;  %v257_v20 = vld [vmem:[%s994_s28 + $0x150] sm:$0xff] }
  0x1b   : > { %766 = vmatpush.xpose.msk.msra.mxu2 %vm289_vm0, %v261_v4  ;;  %v275_v13 = vld [vmem:[%s994_s28 + $0x1e0] sm:$0xff]  ;;  %v274_v17 = vld [vmem:[%s994_s28 + $0x1d8] sm:$0xff]  ;;  %v273_v21 = vld [vmem:[%s994_s28 + $0x1d0] sm:$0xff] }
  0x1c   : > { %783 = vmatpush.xpose.msk.msra.mxu3 %vm289_vm0, %v277_v5  ;;  %v243_v14 = vld [vmem:[%s994_s28 + $0xe0] sm:$0xff]  ;;  %v242_v18 = vld [vmem:[%s994_s28 + $0xd8] sm:$0xff]  ;;  %v241_v22 = vld [vmem:[%s994_s28 + $0xd0] sm:$0xff] }
  0x1d   : > { %749 = vmatpush.xpose.msk.msra.mxu1 %vm289_vm0, %v245_v6  ;;  %v227_v15 = vld [vmem:[%s994_s28 + $0x60] sm:$0xff]  ;;  %v226_v19 = vld [vmem:[%s994_s28 + $0x58] sm:$0xff]  ;;  %v225_v23 = vld [vmem:[%s994_s28 + $0x50] sm:$0xff] }
  0x1e   : > { %732 = vmatpush.xpose.msk.msra.mxu0 %vm289_vm0, %v229_v7  ;;  %v256_v24 = vld [vmem:[%s994_s28 + $0x148] sm:$0xff]  ;;  %v255_v28 = vld [vmem:[%s994_s28 + $0x140] sm:$0xff]  ;;  %v254_v32 = vld [vmem:[%s994_s28 + $0x138] sm:$0xff] }
  0x1f   : > { %767 = vmatpush.xpose.msk.msra.mxu2 %vm289_vm0, %v260_v8  ;;  %v272_v25 = vld [vmem:[%s994_s28 + $0x1c8] sm:$0xff]  ;;  %v271_v29 = vld [vmem:[%s994_s28 + $0x1c0] sm:$0xff]  ;;  %v270_v33 = vld [vmem:[%s994_s28 + $0x1b8] sm:$0xff] }
  0x20   : > { %784 = vmatpush.xpose.msk.msra.mxu3 %vm289_vm0, %v276_v9  ;;  %v240_v26 = vld [vmem:[%s994_s28 + $0xc8] sm:$0xff]  ;;  %v239_v30 = vld [vmem:[%s994_s28 + $0xc0] sm:$0xff]  ;;  %v238_v34 = vld [vmem:[%s994_s28 + $0xb8] sm:$0xff] }
  0x21   : > { %750 = vmatpush.xpose.msk.msra.mxu1 %vm289_vm0, %v244_v10  ;;  %v224_v27 = vld [vmem:[%s994_s28 + $0x48] sm:$0xff]  ;;  %v223_v31 = vld [vmem:[%s994_s28 + $0x40] sm:$0xff]  ;;  %v222_v35 = vld [vmem:[%s994_s28 + $0x38] sm:$0xff] }
  0x22   : > { %733 = vmatpush.xpose.msk.msra.mxu0 %vm289_vm0, %v228_v11  ;;  %v253_v36 = vld [vmem:[%s994_s28 + $0x130] sm:$0xff]  ;;  %v252_v40 = vld [vmem:[%s994_s28 + $0x128] sm:$0xff]  ;;  %v251_v44 = vld [vmem:[%s994_s28 + $0x120] sm:$0xff] }
  0x23   : > { %768 = vmatpush.xpose.msk.msra.mxu2 %vm289_vm0, %v259_v12  ;;  %v269_v37 = vld [vmem:[%s994_s28 + $0x1b0] sm:$0xff]  ;;  %v268_v41 = vld [vmem:[%s994_s28 + $0x1a8] sm:$0xff]  ;;  %v267_v45 = vld [vmem:[%s994_s28 + $0x1a0] sm:$0xff] }
  0x24   : > { %785 = vmatpush.xpose.msk.msra.mxu3 %vm289_vm0, %v275_v13  ;;  %v237_v38 = vld [vmem:[%s994_s28 + $0xb0] sm:$0xff]  ;;  %v236_v42 = vld [vmem:[%s994_s28 + $0xa8] sm:$0xff]  ;;  %v235_v46 = vld [vmem:[%s994_s28 + $0xa0] sm:$0xff] }
  0x25   : > { %751 = vmatpush.xpose.msk.msra.mxu1 %vm289_vm0, %v243_v14  ;;  %v221_v39 = vld [vmem:[%s994_s28 + $0x30] sm:$0xff]  ;;  %v220_v43 = vld [vmem:[%s994_s28 + $0x28] sm:$0xff]  ;;  %v219_v47 = vld [vmem:[%s994_s28 + $0x20] sm:$0xff] }
  0x26   : > { %734 = vmatpush.xpose.msk.msra.mxu0 %vm289_vm0, %v227_v15  ;;  %v250_v48 = vld [vmem:[%s994_s28 + $0x118] sm:$0xff]  ;;  %v249_v52 = vld [vmem:[%s994_s28 + $0x110] sm:$0xff]  ;;  %v248_v56 = vld [vmem:[%s994_s28 + $0x108] sm:$0xff] }
  0x27   : > { %769 = vmatpush.xpose.msk.msra.mxu2 %vm289_vm0, %v258_v16  ;;  %v266_v49 = vld [vmem:[%s994_s28 + $0x198] sm:$0xff]  ;;  %v265_v53 = vld [vmem:[%s994_s28 + $0x190] sm:$0xff]  ;;  %v264_v57 = vld [vmem:[%s994_s28 + $0x188] sm:$0xff] }
  0x28   : > { %786 = vmatpush.xpose.msk.msra.mxu3 %vm289_vm0, %v274_v17  ;;  %v234_v50 = vld [vmem:[%s994_s28 + $0x98] sm:$0xff]  ;;  %v233_v54 = vld [vmem:[%s994_s28 + $0x90] sm:$0xff]  ;;  %v232_v58 = vld [vmem:[%s994_s28 + $0x88] sm:$0xff] }
  0x29   : > { %752 = vmatpush.xpose.msk.msra.mxu1 %vm289_vm0, %v242_v18  ;;  %v218_v51 = vld [vmem:[%s994_s28 + $0x18] sm:$0xff]  ;;  %v217_v55 = vld [vmem:[%s994_s28 + $0x10] sm:$0xff]  ;;  %v216_v59 = vld [vmem:[%s994_s28 + $0x8] sm:$0xff] }
  0x2a   : > { %735 = vmatpush.xpose.msk.msra.mxu0 %vm289_vm0, %v226_v19  ;;  %v247_v60 = vld [vmem:[%s994_s28 + $0x100] sm:$0xff] }
  0x2b   : > { %770 = vmatpush.xpose.msk.msra.mxu2 %vm289_vm0, %v257_v20  ;;  %v263_v61 = vld [vmem:[%s994_s28 + $0x180] sm:$0xff] }
  0x2c   : > { %787 = vmatpush.xpose.msk.msra.mxu3 %vm289_vm0, %v273_v21  ;;  %v231_v62 = vld [vmem:[%s994_s28 + $0x80] sm:$0xff] }
  0x2d   : > { %753 = vmatpush.xpose.msk.msra.mxu1 %vm289_vm0, %v241_v22  ;;  %v215_v63 = vld [vmem:[%s994_s28] sm:$0xff]  ;;  %s872_s28 = sshra.s32 %s651_s26, 4  ;;  %s873_s28 = int_to_ptr.hbm [resolvable:$true] %s872_s28 }
  0x2e   : > { %736 = vmatpush.xpose.msk.msra.mxu0 %vm289_vm0, %v225_v23  ;;  %v214_v0 = vld [vmem:[%s1191_s1] sm:$0x1]  ;;  %s874_s29 = scalar_lea.hbm %s873_s28, 8  ;;  %p879_p1 = scmp.lt.s32.totalorder %s873_s28, %s1193_s3 }
  0x2f   : > { %771 = vmatpush.xpose.msk.msra.mxu2 %vm289_vm0, %v256_v24  ;;  %v279_v1 = vld [vmem:[%s1135_s8] ss:$2 sm:$0xf]  ;;  %p875_p12 = scmp.ne.s32.totalorder %s873_s28, %s874_s29  ;;  %p880_p2 = scmp.lt.s32.totalorder %s878_s4, %s874_s29 }
  0x30   : > { %788 = vmatpush.xpose.msk.msra.mxu3 %vm289_vm0, %v272_v25  ;;  %v282_v2 = vperm.slane %v279_v1, 1  ;;  %v281_v3 = vperm.slane %v279_v1, 0  ;;  %v283_v8 = vperm.slane %v279_v1, 2  ;;  %v284_v9 = vperm.slane %v279_v1, 3 }
  0x31   : > { %754 = vmatpush.xpose.msk.msra.mxu1 %vm289_vm0, %v240_v26  ;;  %p876_p13 = pnand %p875_p12, %p980_p5  ;;  %p881_p3 = por %p880_p2, %p879_p1 }
  0x32   : > { %737 = vmatpush.xpose.msk.msra.mxu0 %vm289_vm0, %v224_v27  ;;  %v616_v27 = vlaneseq }
  0x33   : > { %772 = vmatpush.xpose.msk.msra.mxu2 %vm289_vm0, %v255_v28  ;;  %p877_p0 = pneg %p876_p13 }
  0x34   : > { %789 = vmatpush.xpose.msk.msra.mxu3 %vm289_vm0, %v271_v29  ;;  %vm1142_vm4 = vcmp.lt.s32.totalorder %v616_v27, 512 }
  0x35   : > { %755 = vmatpush.xpose.msk.msra.mxu1 %vm289_vm0, %v239_v30  ;;  %p882_p4 = pnand %p881_p3, %p877_p0 }
  0x36   : > { %738 = vmatpush.xpose.msk.msra.mxu0 %vm289_vm0, %v223_v31 }
  0x37   : > { %773 = vmatpush.xpose.msk.msra.mxu2 %vm289_vm0, %v254_v32 }
  0x38   : > { %790 = vmatpush.xpose.msk.msra.mxu3 %vm289_vm0, %v270_v33 }
  0x39   : > { %756 = vmatpush.xpose.msk.msra.mxu1 %vm289_vm0, %v238_v34 }
  0x3a   : > { %739 = vmatpush.xpose.msk.msra.mxu0 %vm289_vm0, %v222_v35 }
  0x3b   : > { %774 = vmatpush.xpose.msk.msra.mxu2 %vm289_vm0, %v253_v36 }
  0x3c   : > { %791 = vmatpush.xpose.msk.msra.mxu3 %vm289_vm0, %v269_v37 }
  0x3d   : > { %757 = vmatpush.xpose.msk.msra.mxu1 %vm289_vm0, %v237_v38 }
  0x3e   : > { %740 = vmatpush.xpose.msk.msra.mxu0 %vm289_vm0, %v221_v39 }
  0x3f   : > { %775 = vmatpush.xpose.msk.msra.mxu2 %vm289_vm0, %v252_v40 }
  0x40   : > { %792 = vmatpush.xpose.msk.msra.mxu3 %vm289_vm0, %v268_v41 }
  0x41   : > { %758 = vmatpush.xpose.msk.msra.mxu1 %vm289_vm0, %v236_v42 }
  0x42   : > { %741 = vmatpush.xpose.msk.msra.mxu0 %vm289_vm0, %v220_v43 }
  0x43   : > { %776 = vmatpush.xpose.msk.msra.mxu2 %vm289_vm0, %v251_v44 }
  0x44   : > { %793 = vmatpush.xpose.msk.msra.mxu3 %vm289_vm0, %v267_v45 }
  0x45   : > { %759 = vmatpush.xpose.msk.msra.mxu1 %vm289_vm0, %v235_v46 }
  0x46   : > { %742 = vmatpush.xpose.msk.msra.mxu0 %vm289_vm0, %v219_v47  ;;  %v799_v47 = vld [vmem:[%s1135_s8 + $0x1] ss:$2 sm:$0xf] }
  0x47   : > { %777 = vmatpush.xpose.msk.msra.mxu2 %vm289_vm0, %v250_v48 }
  0x48   : > { %794 = vmatpush.xpose.msk.msra.mxu3 %vm289_vm0, %v266_v49 }
  0x49   : > { %760 = vmatpush.xpose.msk.msra.mxu1 %vm289_vm0, %v234_v50 }
  0x4a   : > { %743 = vmatpush.xpose.msk.msra.mxu0 %vm289_vm0, %v218_v51  ;;  %v579_v51 = vsub.f32 0.0, %v799_v47 }
  0x4b   : > { %778 = vmatpush.xpose.msk.msra.mxu2 %vm289_vm0, %v249_v52 }
  0x4c   : > { %795 = vmatpush.xpose.msk.msra.mxu3 %vm289_vm0, %v265_v53 }
  0x4d   : > { %761 = vmatpush.xpose.msk.msra.mxu1 %vm289_vm0, %v233_v54 }
  0x4e   : > { %744 = vmatpush.xpose.msk.msra.mxu0 %vm289_vm0, %v217_v55 }
  0x4f   : > { %779 = vmatpush.xpose.msk.msra.mxu2 %vm289_vm0, %v248_v56 }
  0x50   : > { %796 = vmatpush.xpose.msk.msra.mxu3 %vm289_vm0, %v264_v57 }
  0x51   : > { %762 = vmatpush.xpose.msk.msra.mxu1 %vm289_vm0, %v232_v58 }
  0x52   : > { %745 = vmatpush.xpose.msk.msra.mxu0 %vm289_vm0, %v216_v59 }
  0x53   : > { %780 = vmatpush.xpose.msk.msra.mxu2 %vm289_vm0, %v247_v60 }
  0x54   : > { %797 = vmatpush.xpose.msk.msra.mxu3 %vm289_vm0, %v263_v61 }
  0x55   : > { %763 = vmatpush.xpose.msk.msra.mxu1 %vm289_vm0, %v231_v62 }
  0x56   : > { %746 = vmatpush.xpose.msk.msra.mxu0 %vm289_vm0, %v215_v63  ;;  %781 = vmatmul.msk.f32.vlgmr.msra.gmra.mxu2 %vm289_vm0, %v214_v0 }
  0x57   : > { %798 = vmatmul.msk.f32.vlgmr.msra.gmra.mxu3 %vm289_vm0, %v214_v0 }
  0x58   : > { %764 = vmatmul.msk.f32.vlgmr.msra.gmra.mxu1 %vm289_vm0, %v214_v0 }
  0x59   : > { %747 = vmatmul.msk.f32.vlgmr.msra.gmra.mxu0 %vm289_vm0, %v214_v0 }
  0xd5   : > { %v522_v4 = vpop.f32.mrf.mxu1 }
  0xd6   : > { %v502_v5 = vpop.f32.mrf.mxu0  ;;  %v523_v6 = vadd.f32 %v522_v4, %v282_v2 }
  0xd7   : > { %v503_v7 = vadd.f32 %v502_v5, %v281_v3 }
  0xd8   : > { %846 = vpow2.f32 %v523_v6 }
  0xd9   : > { %848 = vpow2.f32 %v503_v7  ;;  %v542_v10 = vpop.f32.mrf.mxu2 }
  0xda   : > { %v562_v11 = vpop.f32.mrf.mxu3  ;;  %v543_v12 = vadd.f32 %v542_v10, %v283_v8 }
  0xdb   : > { %v563_v13 = vadd.f32 %v562_v11, %v284_v9 }
  0xdc   : > { %850 = vpow2.f32 %v543_v12 }
  0xdd   : > { %852 = vpow2.f32 %v563_v13 }
  0xde   : > { %v847_v14 = vpop.eup %846 }
  0xdf   : > { %v849_v15 = vpop.eup %848  ;;  %v570_v16 = vmax.f32 %v847_v14, 0.010416667 }
  0xe0   : > { %v569_v17 = vmax.f32 %v849_v15, 0.010416667 }
  0xe1   : > { %v574_v18 = vmin.f32 %v570_v16, 270.0 }
  0xe2   : > { %v851_v19 = vpop.eup %850  ;;  %v573_v21 = vmin.f32 %v569_v17, 270.0 }
  0xe3   : > { %v581_v20 = vadd.f32 1e-06, %v574_v18  ;;  %v853_v22 = vpop.eup %852  ;;  %v571_v23 = vmax.f32 %v851_v19, 0.010416667  ;;  %v625_v24 = vrot.slane %v574_v18, 7 }
  0xe4   : > { %v572_v25 = vmax.f32 %v853_v22, 0.010416667  ;;  %v580_v30 = vadd.f32 1e-06, %v573_v21 }
  0xe5   : > { %v575_v26 = vmin.f32 %v571_v23, 270.0  ;;  %v588_v28 = vrot.slane %v581_v20, 7  ;;  %v628_v35 = vsel %vm591_vm1, %v573_v21, %v625_v24 }
  0xe6   : > { %v576_v29 = vmin.f32 %v572_v25, 270.0 }
  0xe7   : > { %v582_v31 = vadd.f32 1e-06, %v575_v26  ;;  %v626_v32 = vrot.slane %v575_v26, 6  ;;  %v592_v40 = vsel %vm591_vm1, %v580_v30, %v588_v28 }
  0xe8   : > { %v583_v33 = vadd.f32 1e-06, %v576_v29  ;;  %v627_v34 = vrot.slane %v576_v29, 5 }
  0xe9   : > { %v589_v36 = vrot.slane %v582_v31, 6 }
  0xea   : > { %v590_v38 = vrot.slane %v583_v33, 5  ;;  %v629_v39 = vsel %vm593_vm2, %v626_v32, %v627_v34 }
  0xeb   : > { %v630_v41 = vsel %vm595_vm3, %v628_v35, %v629_v39 }
  0xec   : > { %v594_v42 = vsel %vm593_vm2, %v589_v36, %v590_v38  ;;  %800 = vst.msk [vmem:[%s1147_s11 + $0x1] ss:$2 sm:$0xf] %vm1142_vm4, %v630_v41 }
  0xed   : > { %v596_v43 = vsel %vm595_vm3, %v592_v40, %v594_v42 }
  0xee   : > { %854 = vrcp.f32 %v596_v43  ;;  %v609_v48 = vand.u32 2147483648, %v596_v43  ;;  %v607_v50 = vand.u32 2147483647, %v596_v43  ;;  %vm603_vm6 = vweird.f32 %v596_v43 }
  0xf0   : > { %v610_v53 = vor.u32 1.1754944e-38, %v609_v48  ;;  %vm608_vm8 = vcmp.eq.f32.partialorder %v607_v50, 8.507059e+37 }
  0xf4   : > { %v855_v44 = vpop.eup %854 }
  0xf5   : > { %v599_v45 = vmul.f32 %v855_v44, %v596_v43  ;;  %vm604_vm5 = vweird.f32 %v855_v44 }
  0xf6   : > { %vm605_vm7 = vmor %vm603_vm6, %vm604_vm5 }
  0xf7   : > { %v600_v46 = vsub.f32 1.0, %v599_v45 }
  0xf9   : > { %v601_v49 = vmul.f32 %v855_v44, %v600_v46 }
  0xfb   : > { %v602_v52 = vadd.f32 %v855_v44, %v601_v49 }
  0xfd   : > { %v606_v54 = vsel %vm605_vm7, %v855_v44, %v602_v52 }
  0xfe   : > { %v611_v55 = vsel %vm608_vm8, %v610_v53, %v606_v54 }
  0xff   : > { %v612_v56 = vmul.f32 %v611_v55, %v579_v51 }
 0x101   : > { %856 = vpow2.f32 %v612_v56 }
 0x107   : > { %v857_v57 = vpop.eup %856 }
 0x108   : > { %v614_v58 = vmax.f32 %v857_v57, 0.0001 }
 0x10a   : > { %v615_v59 = vmin.f32 %v614_v58, 0.9999 }
 0x10c   : > { %620 = vst.msk [vmem:[%s1147_s11] ss:$2 sm:$0xf] %vm1142_vm4, %v615_v59 }
 0x10d   : > { %885 = shalt.err (!%p882_p4)
}
 0x10e   : > { %807 = dma.vmem_to_hbm [thread:$0]  (%p980_p5), %s649_s25, 128, %s651_s26, %s635_s27  }
 0x10f PF: > { %p813_p7 = scmp.ge.s32.totalorder %s920_s15, 2  ;;  %s662_s7 = sand.u32 1, %s908_s12  }
 0x110   : > { %s663_s8 = scalar_lea.sflag [#allocation3], %s662_s7 }
 0x111   : > { %p810_p8 = pnand %p813_p7, %p984_p6 }
 0x113   : > { %p811_p9 = pneg %p810_p8 }
 0x115   : > { %903 = dma.done.wait (%p811_p9), %s663_s8, 128  }
 0x116   : > { %905 = vsyncadd (%p811_p9), %s663_s8, 4294967168  ;;  %p13_p10 = scmp.ge.s32.totalorder %s967_s18, 4   ;;  %s1198_s12 = smov %s912_s13 }
 0x117   : > { %s1199_s13 = smov %s916_s14  ;;  %s1200_s14 = smov %s978_s21 }
 0x118   : > { %s1201_s15 = smov %s967_s18  ;;  %15 = sbr.rel (!%p13_p10) target bundleno = 3 (0x3), region = 72 }
 0x11d   :  { %669 = vsyncpa [#allocation3], 1 }
 0x11e   :  { %671 = vsyncpa [#allocation3 + $0x1], 1 }

</bundles_post_ra>
